<compile_context>
chip_gen: v6e
topology: v6e:2x2x1
jax: 0.10.0
libtpu: 0.0.40
codegen_flags: <defaults>
</compile_context>

<pallas_src>
import functools

import jax
import jax.numpy as jnp
from jax import lax
from jax.experimental import pallas as pl
from jax.experimental.pallas import tpu as pltpu


# ------------------------------ small helpers ------------------------------

def _elu(z):
    # ELU(alpha=1).  exp(min(z,0)) - 1 avoids overflow on the discarded branch;
    # precision loss vs expm1 near 0 (~1e-7 abs) is far below bf16 quantization.
    zf = z.astype(jnp.float32)
    return jnp.where(zf > 0, zf, jnp.exp(jnp.minimum(zf, 0.0)) - 1.0)


def _round_up(x, m):
    return (x + m - 1) // m * m


def _divisor_leq(n, target):
    t = max(1, min(n, int(target)))
    while n % t:
        t -= 1
    return t


def _bn_fold(gamma, beta, mean, var, eps=1e-5):
    scale = gamma / jnp.sqrt(var + eps)
    shift = beta - mean * scale
    return scale, shift


# -------------------- fused GEMM (+bias+ELU) Pallas kernel ------------------
# Used for ConvTranspose3d(k=2, s=2) + BN + ELU (it is a pure per-voxel GEMM).

def _gemm_bias_elu_kernel(x_ref, w_ref, b_ref, o_ref, acc_ref):
    @pl.when(pl.program_id(2) == 0)
    def _init():
        acc_ref[...] = jnp.zeros_like(acc_ref)

    acc_ref[...] += jnp.dot(x_ref[...], w_ref[...],
                            preferred_element_type=jnp.float32)

    @pl.when(pl.program_id(2) == pl.num_programs(2) - 1)
    def _fini():
        o_ref[...] = _elu(acc_ref[...] + b_ref[...]).astype(o_ref.dtype)


def gemm_bias_elu(x, w, b):
    """ELU(x @ w + b): bf16 MXU operands + bf16 output, f32 accumulation."""
    M, K = x.shape
    K2, Nc = w.shape
    assert K == K2

    # M tiling: at least two M blocks whenever possible (keeps both v7x
    # TensorCores busy) and 16-row aligned for bf16 sublane packing.
    Mp = _round_up(M, 16)
    if Mp <= 32:
        tm = Mp
    elif Mp <= 2048:
        tm = _round_up(pl.cdiv(Mp, 2), 16)
        Mp = _round_up(Mp, tm)
    else:
        tm = 512
        Mp = _round_up(Mp, tm)
    if K <= 1024:
        Kp, tk = K, K
    else:
        tk = 512
        Kp = _round_up(K, tk)
    if Nc <= 512:
        Np, tn = Nc, Nc
    else:
        tn = 256
        Np = _round_up(Nc, tn)

    xb = jnp.pad(x.astype(jnp.bfloat16), ((0, Mp - M), (0, Kp - K)))
    wb = jnp.pad(w.astype(jnp.bfloat16), ((0, Kp - K), (0, Np - Nc)))
    bb = jnp.pad(b.astype(jnp.float32).reshape(1, Nc), ((0, 0), (0, Np - Nc)))

    out = pl.pallas_call(
        _gemm_bias_elu_kernel,
        out_shape=jax.ShapeDtypeStruct((Mp, Np), jnp.bfloat16),
        grid=(Mp // tm, Np // tn, Kp // tk),
        in_specs=[
            pl.BlockSpec((tm, tk), lambda i, j, k: (i, k)),
            pl.BlockSpec((tk, tn), lambda i, j, k: (k, j)),
            pl.BlockSpec((1, tn), lambda i, j, k: (0, j)),
        ],
        out_specs=pl.BlockSpec((tm, tn), lambda i, j, k: (i, j)),
        scratch_shapes=[pltpu.VMEM((tm, tn), jnp.float32)],
        compiler_params=pltpu.CompilerParams(
            dimension_semantics=("parallel", "parallel", "arbitrary"),
            vmem_limit_bytes=48 * 1024 * 1024),
        cost_estimate=pl.CostEstimate(
            flops=2 * Mp * Kp * Np,
            transcendentals=Mp * Np,
            bytes_accessed=2 * Mp * Kp + 2 * Kp * Np + 2 * Mp * Np + 4 * Np),
    )(xb, wb, bb)
    return out[:M, :Nc]


# ------------- Conv3d(k=5, p=2) + BN + ELU (+residual) Pallas kernel --------
# Halo-DMA design: the padded activation slab for each (n, depth-tile) grid
# step is DMA'd HBM->VMEM with manual double-buffering (prefetch next step
# while computing the current one).  The kw shift is pre-applied once into a
# 5-way scratch slab; 25 (kd,kh) taps each do 5 kw dots summed in registers,
# so the f32 accumulator sees only 25 read-modify-writes per step.

def _conv5_kernel(*refs, bd, nD, H, W, Cin, Cout, has_res):
    if has_res:
        xp_hbm, w_ref, b_ref, res_ref, o_ref, buf, sem, slab_ref, acc_ref = refs
    else:
        xp_hbm, w_ref, b_ref, o_ref, buf, sem, slab_ref, acc_ref = refs
        res_ref = None

    s = pl.program_id(0)
    n_steps = pl.num_programs(0)
    slot = s % 2
    depth = bd + 4

    def slab_copy(step, slot_idx):
        n = step // nD
        d0 = pl.multiple_of((step - n * nD) * bd, bd)   # padded-depth offset
        return pltpu.make_async_copy(
            xp_hbm.at[n, pl.ds(d0, depth)],
            buf.at[pl.ds(slot_idx * depth, depth)],
            sem.at[slot_idx])

    @pl.when(s == 0)            # prime the double buffer on the first step
    def _():
        slab_copy(s, slot).start()

    @pl.when(s + 1 < n_steps)   # prefetch next step's slab behind this compute
    def _():
        slab_copy(s + 1, 1 - slot).start()

    slab_copy(s, slot).wait()

    d_cur = pl.multiple_of(slot * depth, depth)
    # Pre-apply the kw shift once per step: 5 sublane-crossing copies instead
    # of 125 per-tap ones.
    for kw in range(5):
        slab_ref[kw] = buf[pl.ds(d_cur, depth), :, kw:kw + W, :]

    R = bd * H * W
    acc_ref[...] = jnp.zeros_like(acc_ref)

    def tap_body(t, carry):      # t enumerates (kd, kh); kw is unrolled so
        kd = t // 5              # the slice offsets along kw stay static.
        kh = t - kd * 5
        part = jnp.zeros((R, Cout), jnp.float32)
        for kw in range(5):
            x_mat = slab_ref[kw:kw + 1, pl.ds(kd, bd), pl.ds(kh, H), :, :
                             ].reshape(R, Cin)
            part = part + jnp.dot(x_mat, w_ref[t * 5 + kw],
                                  preferred_element_type=jnp.float32)
        acc_ref[...] += part     # 25 accumulator RMWs per step (was 125)
        return carry

    lax.fori_loop(0, 25, tap_body, 0)

    y = _elu(acc_ref[...] + b_ref[...])
    if res_ref is not None:      # fused: last conv + (out + xcat) + ELU
        y = _elu(y + res_ref[...].reshape(R, Cout).astype(jnp.float32))
    o_ref[...] = y.reshape(bd, H, W, Cout).astype(o_ref.dtype)


def conv5_bn_elu(x, w_dhwio, b, res=None, out_dtype=jnp.float32):
    """x: (N,D,H,W,Cin); w_dhwio: (5,5,5,Cin,Cout) BN-folded; b: (Cout,)."""
    N, D, H, W, Cin = x.shape
    Cout = w_dhwio.shape[-1]

    # Depth tile: target ~2048 output rows per step, per-slot slab <= 2 MiB
    # (x2 slots + 5x kw-slab + acc + resident weights stays < 48 MiB on v7x).
    bd = _divisor_leq(D, max(1, 2048 // max(1, H * W)))
    while bd > 1 and (bd + 4) * (H + 4) * (W + 4) * Cin * 2 > 2 * 1024 * 1024:
        bd = _divisor_leq(D, bd - 1)
    nD = D // bd
    steps = N * nD
    R = bd * H * W

    xp = jnp.pad(x.astype(jnp.bfloat16),
                 ((0, 0), (2, 2), (2, 2), (2, 2), (0, 0)))
    wt = w_dhwio.astype(jnp.bfloat16).reshape(125, Cin, Cout)
    bb = b.astype(jnp.float32).reshape(1, Cout)

    spatial_map = lambda s: (s // nD, s % nD, 0, 0, 0)
    vmem_resident = pl.BlockSpec(memory_space=pltpu.MemorySpace.VMEM)
    in_specs = [
        pl.BlockSpec(memory_space=pl.ANY),   # padded activations stay in HBM
        vmem_resident,                       # weights: resident, single-buffered
        vmem_resident,                       # bias
    ]
    args = [xp, wt, bb]
    if res is not None:
        in_specs.append(pl.BlockSpec((None, bd, H, W, Cout), spatial_map))
        args.append(res.astype(jnp.bfloat16))

    kernel = functools.partial(_conv5_kernel, bd=bd, nD=nD, H=H, W=W,
                               Cin=Cin, Cout=Cout, has_res=res is not None)
    out_bytes = N * D * H * W * Cout * jnp.dtype(out_dtype).itemsize
    bytes_accessed = (xp.size * 2 + wt.size * 2 + out_bytes
                      + (N * D * H * W * Cout * 2 if res is not None else 0))

    return pl.pallas_call(
        kernel,
        out_shape=jax.ShapeDtypeStruct((N, D, H, W, Cout), out_dtype),
        grid=(steps,),
        in_specs=in_specs,
        out_specs=pl.BlockSpec((None, bd, H, W, Cout), spatial_map),
        scratch_shapes=[
            pltpu.VMEM((2 * (bd + 4), H + 4, W + 4, Cin), jnp.bfloat16),  # 2 slabs
            pltpu.SemaphoreType.DMA((2,)),
            pltpu.VMEM((5, bd + 4, H + 4, W, Cin), jnp.bfloat16),         # kw-slab
            pltpu.VMEM((R, Cout), jnp.float32),                           # acc
        ],
        compiler_params=pltpu.CompilerParams(
            # "arbitrary": the manual cross-step prefetch needs in-order steps.
            dimension_semantics=("arbitrary",),
            vmem_limit_bytes=48 * 1024 * 1024),
        cost_estimate=pl.CostEstimate(
            flops=2 * N * D * H * W * 125 * Cin * Cout,
            transcendentals=2 * N * D * H * W * Cout,
            bytes_accessed=int(bytes_accessed)),
    )(*args)


# ------------------ pure-JAX references (same bf16 quantization) ------------

def ref_gemm_bias_elu(x, w, b):
    y = jnp.dot(x.astype(jnp.bfloat16), w.astype(jnp.bfloat16),
                preferred_element_type=jnp.float32)
    return _elu(y + b.astype(jnp.float32)[None, :]).astype(jnp.bfloat16)


def ref_conv5_bn_elu(x, w_dhwio, b, res=None, out_dtype=jnp.float32):
    y = lax.conv_general_dilated(
        x.astype(jnp.bfloat16), w_dhwio.astype(jnp.bfloat16),
        window_strides=(1, 1, 1), padding=((2, 2), (2, 2), (2, 2)),
        dimension_numbers=("NDHWC", "DHWIO", "NDHWC"),
        preferred_element_type=jnp.float32)
    y = _elu(y + b.astype(jnp.float32))
    if res is not None:
        y = _elu(y + res.astype(jnp.bfloat16).astype(jnp.float32))
    return y.astype(out_dtype)


# ------------------------------ UpTransition --------------------------------

def init_params(key, inChans, outChans, nConvs, joined_inchans=None):
    Ch = outChans // 2
    k = key

    def nxt():
        nonlocal k
        k, sub = jax.random.split(k)
        return sub

    params = {
        # ConvTranspose3d(inChans, Ch, kernel_size=2, stride=2)
        "up_w": 0.2 * jax.random.normal(nxt(), (inChans, Ch, 2, 2, 2), jnp.float32),
        "up_b": 0.1 * jax.random.normal(nxt(), (Ch,), jnp.float32),
        # BatchNorm3d(Ch), eval mode
        "bn1": dict(
            gamma=1.0 + 0.1 * jax.random.normal(nxt(), (Ch,), jnp.float32),
            beta=0.1 * jax.random.normal(nxt(), (Ch,), jnp.float32),
            mean=0.1 * jax.random.normal(nxt(), (Ch,), jnp.float32),
            var=1.0 + 0.1 * jnp.abs(jax.random.normal(nxt(), (Ch,), jnp.float32)),
        ),
        "convs": [],
    }
    cin0 = joined_inchans if joined_inchans else outChans
    for i in range(nConvs):
        in_c = cin0 if i == 0 else outChans
        params["convs"].append(dict(
            # Conv3d(in_c, outChans, kernel_size=5, padding=2)
            w=0.05 * jax.random.normal(nxt(), (outChans, in_c, 5, 5, 5), jnp.float32),
            b=0.1 * jax.random.normal(nxt(), (outChans,), jnp.float32),
            gamma=1.0 + 0.1 * jax.random.normal(nxt(), (outChans,), jnp.float32),
            beta=0.1 * jax.random.normal(nxt(), (outChans,), jnp.float32),
            mean=0.1 * jax.random.normal(nxt(), (outChans,), jnp.float32),
            var=1.0 + 0.1 * jnp.abs(jax.random.normal(nxt(), (outChans,), jnp.float32)),
        ))
    return params


def up_transition_forward(x_ncdhw, skip_ncdhw, params, outChans,
                          joined_inchans=None,
                          matmul_fn=gemm_bias_elu, conv_fn=conv5_bn_elu):
    """UpTransition.forward (elu=True, eval-mode BN / dropout)."""
    Ch = outChans // 2
    x = jnp.transpose(x_ncdhw, (0, 2, 3, 4, 1))        # NCDHW -> NDHWC
    skip = jnp.transpose(skip_ncdhw, (0, 2, 3, 4, 1))
    N, d, h, w, Cin = x.shape

    # --- ConvTranspose3d(k=2,s=2) + BN1(eval) + ELU as one fused GEMM ---
    # Columns ordered (kd, kh, kw, co): channels stay in the lane dim and the
    # pixel shuffle is a cheap (near-contiguous) transpose/reshape.
    scale, shift = _bn_fold(**params["bn1"])
    w_up = jnp.transpose(params["up_w"], (0, 2, 3, 4, 1)).reshape(Cin, 8 * Ch)
    w_eff = w_up * jnp.tile(scale, 8)[None, :]
    b_eff = jnp.tile(params["up_b"] * scale + shift, 8)
    y = matmul_fn(x.reshape(N * d * h * w, Cin), w_eff, b_eff)     # bf16
    y = y.reshape(N, d, h, w, 2, 2, 2, Ch)
    y = jnp.transpose(y, (0, 1, 4, 2, 5, 3, 6, 7)).reshape(
        N, 2 * d, 2 * h, 2 * w, Ch)

    # --- concat with skip connection along channels (kept in bf16) ---
    xcat = jnp.concatenate([y, skip.astype(jnp.bfloat16)], axis=-1)
    residual = (joined_inchans is None) or (joined_inchans == outChans)

    # --- nConvs x (Conv3d 5x5x5 + BN + ELU); last fused with (+xcat, ELU) ---
    cur = xcat
    n_convs = len(params["convs"])
    for i, cp in enumerate(params["convs"]):
        s_, sh_ = _bn_fold(cp["gamma"], cp["beta"], cp["mean"], cp["var"])
        w_t = jnp.transpose(cp["w"], (2, 3, 4, 1, 0)) * s_   # (5,5,5,Cin,Cout)
        b_t = cp["b"] * s_ + sh_
        last = (i == n_convs - 1)
        res = xcat if (residual and last) else None
        out_dtype = jnp.float32 if last else jnp.bfloat16    # bf16 intermediates
        cur = conv_fn(cur, w_t, b_t, res, out_dtype=out_dtype)

    if not residual:
        cur = _elu(cur)   # relu2 applied alone when joined_inchans != outChans

    return jnp.transpose(cur, (0, 4, 1, 2, 3))          # back to NCDHW


# ----------------------------------- main -----------------------------------

if __name__ == "__main__":
    key = jax.random.PRNGKey(0)
    inChans, outChans, nConvs = 4, 8, 2
    N, d = 2, 4                                  # x spatial 4^3 -> output 8^3

    kx, ks, kp = jax.random.split(key, 3)
    x = jax.random.normal(kx, (N, inChans, d, d, d), jnp.float32)
    skip = jax.random.normal(ks, (N, outChans // 2, 2 * d, 2 * d, 2 * d),
                             jnp.float32)
    params = init_params(kp, inChans, outChans, nConvs)

    fwd = functools.partial(up_transition_forward, params=params,
                            outChans=outChans)
    out = jax.block_until_ready(fwd(x, skip))
    ref = jax.block_until_ready(fwd(x, skip, matmul_fn=ref_gemm_bias_elu,
                                    conv_fn=ref_conv5_bn_elu))

    assert out.shape == (N, outChans, 2 * d, 2 * d, 2 * d), out.shape
    max_err = float(jnp.max(jnp.abs(out - ref)))
    assert bool(jnp.allclose(out, ref, atol=5e-3, rtol=5e-3)), max_err
    print("KERNEL_OK")
</pallas_src>

<mosaic_0001>
module attributes {stable_mosaic.version = 11 : i64} {
  func.func @_gemm_bias_elu_kernel(%arg0: i32, %arg1: i32, %arg2: i32, %arg3: memref<64x4xbf16, #tpu.memory_space<vmem>>, %arg4: memref<4x32xbf16, #tpu.memory_space<vmem>>, %arg5: memref<1x32xf32, #tpu.memory_space<vmem>>, %arg6: memref<64x32xbf16, #tpu.memory_space<vmem>>, %arg7: memref<64x32xf32, #tpu.memory_space<vmem>>) attributes {dimension_semantics = [#tpu.dimension_semantics<parallel>, #tpu.dimension_semantics<parallel>, #tpu.dimension_semantics<arbitrary>], iteration_bounds = array<i64: 2, 1, 1>, scalar_prefetch = 0 : i64, scratch_operands = 1 : i64, tpu.core_type = #tpu.core_type<tc>, window_params = [{transform_indices = @transform_0, window_bounds = array<i64: 64, 4>}, {transform_indices = @transform_1, window_bounds = array<i64: 4, 32>}, {transform_indices = @transform_2, window_bounds = array<i64: 1, 32>}, {transform_indices = @transform_3, window_bounds = array<i64: 64, 32>}]} {
    %c0_i32 = arith.constant 0 : i32
    %0 = arith.cmpi eq, %arg2, %c0_i32 : i32
    %1 = arith.extui %0 : i1 to i32
    %c0_i32_0 = arith.constant 0 : i32
    %2 = arith.cmpi ne, %1, %c0_i32_0 : i32
    scf.if %2 {
      %cst_10 = arith.constant 0.000000e+00 : f32
      %12 = vector.broadcast %cst_10 : f32 to vector<64x32xf32>
      %c0_11 = arith.constant 0 : index
      %c0_12 = arith.constant 0 : index
      %13 = vector.load %arg7[%c0_11, %c0_12] : memref<64x32xf32, #tpu.memory_space<vmem>>, vector<64x32xf32>
      tpu.vector_store %arg7[%c0_11, %c0_12], %12 {strides = array<i32>} : memref<64x32xf32, #tpu.memory_space<vmem>>, vector<64x32xf32>,
    } else {
    }
    %c0 = arith.constant 0 : index
    %c0_1 = arith.constant 0 : index
    %3 = vector.load %arg7[%c0, %c0_1] : memref<64x32xf32, #tpu.memory_space<vmem>>, vector<64x32xf32>
    %c0_2 = arith.constant 0 : index
    %c0_3 = arith.constant 0 : index
    %4 = vector.load %arg3[%c0_2, %c0_3] : memref<64x4xbf16, #tpu.memory_space<vmem>>, vector<64x4xbf16>
    %c0_4 = arith.constant 0 : index
    %c0_5 = arith.constant 0 : index
    %5 = vector.load %arg4[%c0_4, %c0_5] : memref<4x32xbf16, #tpu.memory_space<vmem>>, vector<4x32xbf16>
    %cst = arith.constant dense<0.000000e+00> : vector<64x32xf32>
    %6 = tpu.matmul %4, %5, %cst {dimension_numbers = #tpu.dot_dimension_numbers<[1], [0], [0], [1], [0, 0, 1, 1], [], []>} : vector<64x4xbf16>, vector<4x32xbf16>, vector<64x32xf32> -> vector<64x32xf32>
    %7 = arith.addf %3, %6 : vector<64x32xf32>
    %c0_6 = arith.constant 0 : index
    %c0_7 = arith.constant 0 : index
    %8 = vector.load %arg7[%c0_6, %c0_7] : memref<64x32xf32, #tpu.memory_space<vmem>>, vector<64x32xf32>
    tpu.vector_store %arg7[%c0_6, %c0_7], %7 {strides = array<i32>} : memref<64x32xf32, #tpu.memory_space<vmem>>, vector<64x32xf32>,
    %c0_i32_8 = arith.constant 0 : i32
    %9 = arith.cmpi eq, %arg2, %c0_i32_8 : i32
    %10 = arith.extui %9 : i1 to i32
    %c0_i32_9 = arith.constant 0 : i32
    %11 = arith.cmpi ne, %10, %c0_i32_9 : i32
    scf.if %11 {
      %c0_10 = arith.constant 0 : index
      %c0_11 = arith.constant 0 : index
      %12 = vector.load %arg7[%c0_10, %c0_11] : memref<64x32xf32, #tpu.memory_space<vmem>>, vector<64x32xf32>
      %c0_12 = arith.constant 0 : index
      %c0_13 = arith.constant 0 : index
      %13 = vector.load %arg5[%c0_12, %c0_13] : memref<1x32xf32, #tpu.memory_space<vmem>>, vector<1x32xf32>
      %14 = vector.broadcast %13 : vector<1x32xf32> to vector<64x32xf32>
      %15 = arith.addf %12, %14 : vector<64x32xf32>
      %cst_14 = arith.constant 0.000000e+00 : f32
      %16 = vector.broadcast %cst_14 : f32 to vector<64x32xf32>
      %17 = arith.cmpf ogt, %15, %16 : vector<64x32xf32>
      %cst_15 = arith.constant 0.000000e+00 : f32
      %18 = vector.broadcast %cst_15 : f32 to vector<64x32xf32>
      %19 = arith.minimumf %15, %18 : vector<64x32xf32>
      %20 = math.exp %19 : vector<64x32xf32>
      %cst_16 = arith.constant 1.000000e+00 : f32
      %21 = vector.broadcast %cst_16 : f32 to vector<64x32xf32>
      %22 = arith.subf %20, %21 : vector<64x32xf32>
      %23 = arith.select %17, %15, %22 : vector<64x32xi1>, vector<64x32xf32>
      %24 = arith.truncf %23 : vector<64x32xf32> to vector<64x32xbf16>
      %c0_17 = arith.constant 0 : index
      %c0_18 = arith.constant 0 : index
      %25 = vector.load %arg6[%c0_17, %c0_18] : memref<64x32xbf16, #tpu.memory_space<vmem>>, vector<64x32xbf16>
      tpu.vector_store %arg6[%c0_17, %c0_18], %24 {strides = array<i32>} : memref<64x32xbf16, #tpu.memory_space<vmem>>, vector<64x32xbf16>,
    } else {
    }
    return
  }
  func.func @transform_0(%arg0: i32, %arg1: i32, %arg2: i32) -> (i32, i32) {
    %c0_i32 = arith.constant 0 : i32
    return %arg0, %arg2 : i32, i32
  }
  func.func @transform_1(%arg0: i32, %arg1: i32, %arg2: i32) -> (i32, i32) {
    %c0_i32 = arith.constant 0 : i32
    return %arg2, %arg1 : i32, i32
  }
  func.func @transform_2(%arg0: i32, %arg1: i32, %arg2: i32) -> (i32, i32) {
    %c0_i32 = arith.constant 0 : i32
    %c0_i32_0 = arith.constant 0 : i32
    return %c0_i32, %arg1 : i32, i32
  }
  func.func @transform_3(%arg0: i32, %arg1: i32, %arg2: i32) -> (i32, i32) {
    %c0_i32 = arith.constant 0 : i32
    return %arg0, %arg1 : i32, i32
  }
}

</mosaic_0001>

<bundles_post_ra>
// kernel: tpu_custom_call.1
= control target key start
LH: loop header
LB: loop body
LE: loop exit
PB: predicated region body
PF: predicated region fallthrough
CT: control target
= control target key end

     0   :  { %s785_s12 = smov 0   ;;  %s787_s13 = smov 0   ;;  %s868_s0 = inlined_call_operand.vmem [shape: bf16[128,4], index: 0, kind: input, shape index: {}]   ;;  %s869_s1 = inlined_call_operand.vmem [shape: bf16[4,32], index: 1, kind: input, shape index: {}]   ;;  %s870_s2 = inlined_call_operand.vmem [shape: f32[1,32], index: 2, kind: input, shape index: {}]   ;;  %s871_s3 = inlined_call_operand.vmem [shape: bf16[128,32], index: 3, kind: output, shape index: {}]  }
   0x1   :  { %s789_s14 = smov 0  }
   0x2 LB: > { %s32_s15 = sadd.s32 1, %s758_s13  ;;  %p636_p0 = scmp.ge.s32.totalorder %s762_s14, 1  ;;  %s762_s14 = sphi %s789_s14, %s13_s14   ;;  %s758_s13 = sphi %s787_s13, %s873_s13   ;;  %s754_s12 = sphi %s785_s12, %s872_s12  }
   0x3   : > { %p34_p1 = scmp.ge.s32.totalorder %s32_s15, 2  ;;  %p186_p2 = scmp.lt.s32.totalorder %s762_s14, 3 }
   0x5   : > { %s875_s15 = smov (%p34_p1, %s32_s15), 0  ;;  %p187_p3 = pnand %p636_p0, %p186_p2 }
   0x6   : > { %s637_s18 = sshll.u32 (!%p187_p3), %s754_s12, 3 }
   0x7   : > { %190 = sbr.rel (%p187_p3) target bundleno = 253 (0xfd), region = 32  ;;  %p227_p4 = scmp.lt.s32.totalorder (!%p187_p3), %s637_s18, 15 }
   0xc   : > { %v284_v0 = vld [vmem:[%s869_s1] sm:$0x3]  ;;  %vm318_vm0 = vcmask 1041408   ;;  %vm259_vm1 = vcmask 261120   ;;  %v764_v2 = vmov 0.0   ;;  %s877_s18 = smov (!%p227_p4, %s637_s18), 15 }
   0xd   : > { %693 = vmatprep.subr.msk.bf16.mxu0 %vm318_vm0, %v284_v0  ;;  %694 = vmatprep.subr.msk.bf16.mxu1 %vm318_vm0, %v284_v0  ;;  %v320_v1 = vsel %vm318_vm0, %v284_v0, 0  ;;  %262 = vst.msk [vmem:[#allocation2 + $0x10] sm:$0xff] %vm259_vm1, %v764_v2  ;;  %260 = vst.msk [vmem:[#allocation2] sm:$0xff] %vm259_vm1, %v764_v2  ;;  %s638_s19 = sshll.u32 %s877_s18, 2  ;;  %vm305_vm2 = vcmask 31744   ;;  %vm510_vm4 = vcmask 257024  }
   0xe   : > { %682 = vmatpush3.bf16.msra.mxu0 %v320_v1  ;;  %692 = vmatpush3.bf16.msra.mxu1 %v320_v1  ;;  %261 = vst.msk [vmem:[#allocation2 + $0x8] sm:$0xff] %vm259_vm1, %v764_v2  ;;  %263 = vst.msk [vmem:[#allocation2 + $0x18] sm:$0xff] %vm259_vm1, %v764_v2  ;;  %s233_s22 = scalar_lea.vmem %s868_s0, %s638_s19  ;;  %v649_v30 = vld [vmem:[%s870_s2] ss:$0 sm:$0xff]  ;;  %s841_s27 = scalar_lea.vmem %s871_s3, %s638_s19 }
   0xf   : > { %264 = vst.msk [vmem:[#allocation2 + $0x20] sm:$0xff] %vm259_vm1, %v764_v2  ;;  %265 = vst.msk [vmem:[#allocation2 + $0x28] sm:$0xff] %vm259_vm1, %v764_v2  ;;  %v720_v3 = vld [vmem:[%s233_s22] sm:$0xff]   ;;  %v721_v4 = vld [vmem:[%s233_s22 + $0x10] sm:$0xff]  }
  0x10   : > { %266 = vst.msk [vmem:[#allocation2 + $0x30] sm:$0xff] %vm259_vm1, %v764_v2  ;;  %267 = vst.msk [vmem:[#allocation2 + $0x38] sm:$0xff] %vm259_vm1, %v764_v2  ;;  %683 = vmatprep.mubr.msk.bf16.mxu0 %vm305_vm2, %v720_v3  ;;  %v722_v5 = vld [vmem:[%s233_s22 + $0x8] sm:$0xff]   ;;  %687 = vmatprep.mubr.msk.bf16.mxu1 %vm305_vm2, %v721_v4  ;;  %v723_v6 = vld [vmem:[%s233_s22 + $0x18] sm:$0xff]  }
  0x11   : > { %684 = vmatmul.mubr.msk.bf16.vlgmr.msra.gmra.mxu0 %vm305_vm2, %v722_v5  ;;  %688 = vmatmul.mubr.msk.bf16.vlgmr.msra.gmra.mxu1 %vm305_vm2, %v723_v6 }
  0x14   : > { %v270_v7 = vld [vmem:[#allocation2 + $0x10] sm:$0xff]  ;;  %v268_v10 = vld [vmem:[#allocation2] sm:$0xff] }
  0x15   : > { %v271_v16 = vld [vmem:[#allocation2 + $0x18] sm:$0xff]  ;;  %v269_v22 = vld [vmem:[#allocation2 + $0x8] sm:$0xff] }
  0x16   : > { %v272_v13 = vld [vmem:[#allocation2 + $0x20] sm:$0xff]  ;;  %v273_v25 = vld [vmem:[#allocation2 + $0x28] sm:$0xff] }
  0x17   : > { %v274_v8 = vld [vmem:[#allocation2 + $0x30] sm:$0xff]  ;;  %v275_v19 = vld [vmem:[#allocation2 + $0x38] sm:$0xff] }
  0xd1   : > { %v685_v9 = vpop.f32.mrf.mxu0  ;;  %v689_v12 = vpop.f32.mrf.mxu1 }
  0xd2   : > { %v389_v11 = vadd.f32 %v685_v9, %v270_v7  ;;  %v393_v14 = vadd.f32 %v689_v12, %v274_v8 }
  0xd3   : > { %v356_v15 = vpop.f32.mrf.mxu0  ;;  %v372_v18 = vpop.f32.mrf.mxu1 }
  0xd4   : > { %398 = vst.msk [vmem:[#allocation2 + $0x10] sm:$0xff] %vm259_vm1, %v389_v11  ;;  %v387_v17 = vadd.f32 %v356_v15, %v268_v10  ;;  %402 = vst.msk [vmem:[#allocation2 + $0x30] sm:$0xff] %vm259_vm1, %v393_v14  ;;  %v391_v20 = vadd.f32 %v372_v18, %v272_v13 }
  0xd5   : > { %v686_v21 = vpop.f32.mrf.mxu0  ;;  %v690_v24 = vpop.f32.mrf.mxu1 }
  0xd6   : > { %396 = vst.msk [vmem:[#allocation2] sm:$0xff] %vm259_vm1, %v387_v17  ;;  %v390_v23 = vadd.f32 %v686_v21, %v271_v16  ;;  %400 = vst.msk [vmem:[#allocation2 + $0x20] sm:$0xff] %vm259_vm1, %v391_v20  ;;  %v394_v26 = vadd.f32 %v690_v24, %v275_v19 }
  0xd7   : > { %v359_v27 = vpop.f32.mrf.mxu0  ;;  %v375_v29 = vpop.f32.mrf.mxu1 }
  0xd8   : > { %399 = vst.msk [vmem:[#allocation2 + $0x18] sm:$0xff] %vm259_vm1, %v390_v23  ;;  %v388_v28 = vadd.f32 %v359_v27, %v269_v22  ;;  %403 = vst.msk [vmem:[#allocation2 + $0x38] sm:$0xff] %vm259_vm1, %v394_v26  ;;  %v392_v31 = vadd.f32 %v375_v29, %v273_v25 }
  0xda   : > { %397 = vst.msk [vmem:[#allocation2 + $0x8] sm:$0xff] %vm259_vm1, %v388_v28  ;;  %401 = vst.msk [vmem:[#allocation2 + $0x28] sm:$0xff] %vm259_vm1, %v392_v31 }
  0xdb   : > { %v409_v32 = vld [vmem:[#allocation2 + $0x10] sm:$0xff] }
  0xdc   : > { %v424_v33 = vadd.f32 %v649_v30, %v409_v32  ;;  %v413_v34 = vld [vmem:[#allocation2 + $0x30] sm:$0xff] }
  0xdd   : > { %v428_v35 = vadd.f32 %v649_v30, %v413_v34  ;;  %v407_v36 = vld [vmem:[#allocation2] sm:$0xff] }
  0xde   : > { %v440_v37 = vmin.f32 %v424_v33, 0.0  ;;  %v422_v38 = vadd.f32 %v649_v30, %v407_v36  ;;  %v411_v39 = vld [vmem:[#allocation2 + $0x20] sm:$0xff]  ;;  %vm432_vm3 = vcmp.gt.f32.partialorder %v424_v33, 0.0 }
  0xdf   : > { %v444_v40 = vmin.f32 %v428_v35, 0.0  ;;  %v426_v41 = vadd.f32 %v649_v30, %v411_v39  ;;  %v410_v42 = vld [vmem:[#allocation2 + $0x18] sm:$0xff]  ;;  %vm436_vm5 = vcmp.gt.f32.partialorder %v428_v35, 0.0 }
  0xe0   : > { %v450_v43 = vmul.f32 1.442695, %v440_v37  ;;  %v438_v44 = vmin.f32 %v422_v38, 0.0  ;;  %v425_v45 = vadd.f32 %v649_v30, %v410_v42  ;;  %v414_v46 = vld [vmem:[#allocation2 + $0x38] sm:$0xff]  ;;  %vm430_vm6 = vcmp.gt.f32.partialorder %v422_v38, 0.0 }
  0xe1   : > { %v458_v47 = vmul.f32 1.442695, %v444_v40  ;;  %v442_v48 = vmin.f32 %v426_v41, 0.0  ;;  %v429_v49 = vadd.f32 %v649_v30, %v414_v46  ;;  %v408_v50 = vld [vmem:[#allocation2 + $0x8] sm:$0xff]  ;;  %vm434_vm7 = vcmp.gt.f32.partialorder %v426_v41, 0.0 }
  0xe2   : > { %724 = vpow2.f32 %v450_v43  ;;  %v446_v51 = vmul.f32 1.442695, %v438_v44  ;;  %v441_v52 = vmin.f32 %v425_v45, 0.0  ;;  %v412_v53 = vld [vmem:[#allocation2 + $0x28] sm:$0xff]  ;;  %v423_v57 = vadd.f32 %v649_v30, %v408_v50 }
  0xe3   : > { %726 = vpow2.f32 %v458_v47  ;;  %v454_v54 = vmul.f32 1.442695, %v442_v48  ;;  %v445_v55 = vmin.f32 %v429_v49, 0.0  ;;  %v427_v58 = vadd.f32 %v649_v30, %v412_v53 }
  0xe4   : > { %728 = vpow2.f32 %v446_v51  ;;  %v452_v56 = vmul.f32 1.442695, %v441_v52  ;;  %v439_v60 = vmin.f32 %v423_v57, 0.0  ;;  %vm433_vm8 = vcmp.gt.f32.partialorder %v425_v45, 0.0 }
  0xe5   : > { %730 = vpow2.f32 %v454_v54  ;;  %v460_v59 = vmul.f32 1.442695, %v445_v55  ;;  %v443_v61 = vmin.f32 %v427_v58, 0.0  ;;  %vm437_vm9 = vcmp.gt.f32.partialorder %v429_v49, 0.0 }
  0xe6   : > { %732 = vpow2.f32 %v452_v56  ;;  %v448_v62 = vmul.f32 1.442695, %v439_v60  ;;  %vm431_vm10 = vcmp.gt.f32.partialorder %v423_v57, 0.0  ;;  %vm435_vm11 = vcmp.gt.f32.partialorder %v427_v58, 0.0 }
  0xe7   : > { %734 = vpow2.f32 %v460_v59  ;;  %v456_v63 = vmul.f32 1.442695, %v443_v61 }
  0xe8   : > { %736 = vpow2.f32 %v448_v62 }
  0xe9   : > { %738 = vpow2.f32 %v456_v63 }
  0xef   : > { %v725_v0 = vpop.eup %724 }
  0xf0   : > { %v727_v1 = vpop.eup %726  ;;  %v652_v2 = vadd.f32 -1.0, %v725_v0 }
  0xf1   : > { %v729_v3 = vpop.eup %728  ;;  %v656_v4 = vadd.f32 -1.0, %v727_v1 }
  0xf2   : > { %v731_v5 = vpop.eup %730  ;;  %v472_v6 = vsel %vm432_vm3, %v424_v33, %v652_v2  ;;  %v650_v7 = vadd.f32 -1.0, %v729_v3 }
  0xf3   : > { %v733_v8 = vpop.eup %732  ;;  %v670_v9 = vpack.c.bf16 %v472_v6, %v472_v6  ;;  %v476_v10 = vsel %vm436_vm5, %v428_v35, %v656_v4  ;;  %v654_v11 = vadd.f32 -1.0, %v731_v5 }
  0xf4   : > { %v735_v12 = vpop.eup %734  ;;  %v674_v13 = vpack.c.bf16 %v476_v10, %v476_v10  ;;  %v470_v14 = vsel %vm430_vm6, %v422_v38, %v650_v7  ;;  %v653_v15 = vadd.f32 -1.0, %v733_v8 }
  0xf5   : > { %513 = vst.msk [vmem:[%s841_s27 + $0x8] sm:$0xf] %vm510_vm4, %v670_v9  ;;  %v668_v16 = vpack.c.bf16 %v470_v14, %v470_v14  ;;  %v474_v17 = vsel %vm434_vm7, %v426_v41, %v654_v11  ;;  %v657_v18 = vadd.f32 -1.0, %v735_v12  ;;  %v737_v21 = vpop.eup %736 }
  0xf6   : > { %517 = vst.msk [vmem:[%s841_s27 + $0x18] sm:$0xf] %vm510_vm4, %v674_v13  ;;  %v672_v19 = vpack.c.bf16 %v474_v17, %v474_v17  ;;  %v473_v20 = vsel %vm433_vm8, %v425_v45, %v653_v15  ;;  %v739_v24 = vpop.eup %738  ;;  %v651_v26 = vadd.f32 -1.0, %v737_v21 }
  0xf7   : > { %511 = vst.msk [vmem:[%s841_s27] sm:$0xf] %vm510_vm4, %v668_v16  ;;  %v671_v22 = vpack.c.bf16 %v473_v20, %v473_v20  ;;  %v477_v23 = vsel %vm437_vm9, %v429_v49, %v657_v18  ;;  %v655_v27 = vadd.f32 -1.0, %v739_v24 }
  0xf8   : > { %515 = vst.msk [vmem:[%s841_s27 + $0x10] sm:$0xf] %vm510_vm4, %v672_v19  ;;  %v675_v25 = vpack.c.bf16 %v477_v23, %v477_v23  ;;  %v471_v28 = vsel %vm431_vm10, %v423_v57, %v651_v26 }
  0xf9   : > { %514 = vst.msk [vmem:[%s841_s27 + $0xc] sm:$0xf] %vm510_vm4, %v671_v22  ;;  %v669_v29 = vpack.c.bf16 %v471_v28, %v471_v28  ;;  %v475_v30 = vsel %vm435_vm11, %v427_v58, %v655_v27 }
  0xfa   : > { %518 = vst.msk [vmem:[%s841_s27 + $0x1c] sm:$0xf] %vm510_vm4, %v675_v25  ;;  %v673_v31 = vpack.c.bf16 %v475_v30, %v475_v30 }
  0xfb   : > { %512 = vst.msk [vmem:[%s841_s27 + $0x4] sm:$0xf] %vm510_vm4, %v669_v29 }
  0xfc   : > { %516 = vst.msk [vmem:[%s841_s27 + $0x14] sm:$0xf] %vm510_vm4, %v673_v31 }
  0xfd PF: > { %s13_s14 = sadd.s32 1, %s762_s14   ;;  %s872_s12 = smov %s758_s13 }
  0xfe   : > { %p10_p5 = scmp.ge.s32.totalorder %s13_s14, 4   ;;  %s873_s13 = smov %s875_s15 }
 0x100   :  { %12 = sbr.rel (!%p10_p5) target bundleno = 2 (0x2), region = 76 }

</bundles_post_ra>
